<compile_context>
chip_gen: v5e
topology: v5e:2x2
jax: 0.10.0
libtpu: 0.0.40
codegen_flags: <defaults>
</compile_context>

<pallas_src>
import functools

import jax
import jax.numpy as jnp
from jax.experimental import pallas as pl
from jax.experimental.pallas import tpu as pltpu


def mean_pool_kernel(h_ref, m_ref, cnt_ref, o_ref, *, seq_len, seq_tile):
    # h_ref: (Bb, TS, TH)   m_ref: (Bb, TS, 1)   cnt_ref: (Bb, 1)   o_ref: (Bb, TH)
    k = pl.program_id(2)

    @pl.when(k == 0)
    def _init():
        o_ref[...] = jnp.zeros_like(o_ref)

    h = h_ref[...].astype(jnp.float32)            # (Bb, TS, TH)
    m = m_ref[...].astype(jnp.float32)            # (Bb, TS, 1)
    prod = h * m                                  # VPU; exact in f32

    # Only emitted when the final sequence tile is partial (static check).
    # Zeroes the padded rows so stale VMEM contents (possibly NaN/Inf) in the
    # block padding of h or m cannot poison the running sum.
    if seq_len % seq_tile != 0:
        col = jax.lax.broadcasted_iota(jnp.int32, (1, seq_tile, 1), 1)
        valid = (k * seq_tile + col) < seq_len
        prod = jnp.where(valid, prod, 0.0)

    o_ref[...] += jnp.sum(prod, axis=1)           # f32 accumulation

    @pl.when(k == pl.num_programs(2) - 1)
    def _finalize():
        o_ref[...] = o_ref[...] / cnt_ref[...]    # counts pre-clamped in wrapper


def _vmem_capacity_bytes(default=64 * 1024 * 1024):
    """Physical VMEM of the current generation (v5e/v6e 128 MiB, v7x 64 MiB)."""
    try:
        info = pltpu.get_tpu_info()
        cap = getattr(info, "vmem_capacity_bytes", None)
        if cap:
            return int(cap)
    except Exception:
        pass
    return default


def _choose_blocks(B, S, H, itemsize, per_buffer_budget):
    """Pick (batch_block, seq_tile) so one hidden tile fits the per-buffer budget."""
    row_bytes = S * H * itemsize

    # Batch blocking: amortize per-step overhead and keep output stores
    # sublane-aligned when whole rows are cheap.
    if B <= 8 and B * row_bytes <= per_buffer_budget:
        batch_block = B
    else:
        batch_block = 1
        for cand in (8, 4, 2):
            if B % cand == 0 and cand * row_bytes <= per_buffer_budget:
                batch_block = cand
                break

    max_ts = max(1, per_buffer_budget // (batch_block * H * itemsize))
    if S <= max_ts:
        seq_tile = S                                # whole sequence in one tile
    elif max_ts >= 128:
        seq_tile = (max_ts // 128) * 128            # lane/sublane friendly
    else:
        # Very large H: fall back to 8-row (sublane-aligned) tiles.
        # TODO(synk): add an H-tiling grid axis if even 8 rows overflow VMEM.
        seq_tile = max(8, (max_ts // 8) * 8)
    return batch_block, seq_tile


def mean_pooling(last_hidden_state, attention_mask):
    """Masked mean pooling, equivalent to the PyTorch MeanPooling.forward."""
    B, S, H = last_hidden_state.shape
    itemsize = jnp.dtype(last_hidden_state.dtype).itemsize

    vmem_cap = _vmem_capacity_bytes()
    # Per-buffer budget for the (double-buffered) hidden tile; leaves room for
    # the f32 elementwise intermediates on narrow input dtypes.
    per_buffer = min(8 * 1024 * 1024, vmem_cap // 12)

    Bb, seq_tile = _choose_blocks(B, S, H, itemsize, per_buffer)
    num_b = B // Bb
    num_k = pl.cdiv(S, seq_tile)

    # Split H into two parallel blocks only when the batch axis cannot feed a
    # second TensorCore (v7x megacore) and the halves stay 128-lane aligned
    # and large enough (>= 512 KiB) to stay near the HBM roofline.
    num_h = 1
    if num_b == 1 and H % 256 == 0 and Bb * seq_tile * (H // 2) * itemsize >= (512 << 10):
        num_h = 2
    h_tile = H // num_h

    tile_bytes = Bb * seq_tile * h_tile * itemsize
    f32_tile_bytes = Bb * seq_tile * h_tile * 4
    # 2x input tile (double-buffered DMA) + f32 intermediates + slack.
    vmem_limit = int(min(vmem_cap,
                         max(32 << 20,
                             2 * tile_bytes + 3 * f32_tile_bytes + (4 << 20))))

    mask3 = attention_mask.reshape(B, S, 1)
    # Per-row valid-token counts, clamped like the PyTorch module (tiny op).
    cnt = jnp.maximum(
        jnp.sum(attention_mask.astype(jnp.float32), axis=1, keepdims=True),
        jnp.float32(1e-9))                                         # (B, 1)

    kernel = functools.partial(mean_pool_kernel, seq_len=S, seq_tile=seq_tile)
    out = pl.pallas_call(
        kernel,
        out_shape=jax.ShapeDtypeStruct((B, H), jnp.float32),
        grid=(num_b, num_h, num_k),
        in_specs=[
            pl.BlockSpec((Bb, seq_tile, h_tile), lambda b, h, k: (b, k, h)),
            pl.BlockSpec((Bb, seq_tile, 1), lambda b, h, k: (b, k, 0)),
            pl.BlockSpec((Bb, 1), lambda b, h, k: (b, 0)),
        ],
        out_specs=pl.BlockSpec((Bb, h_tile), lambda b, h, k: (b, h)),
        compiler_params=pltpu.CompilerParams(
            dimension_semantics=("parallel", "parallel", "arbitrary"),
            vmem_limit_bytes=vmem_limit,
        ),
    )(last_hidden_state, mask3, cnt)
    return out


def mean_pooling_ref(last_hidden_state, attention_mask):
    # Pure-JAX reference mirroring the PyTorch code exactly.
    m = attention_mask[..., None].astype(jnp.float32)               # (B, S, 1)
    sum_emb = jnp.sum(last_hidden_state.astype(jnp.float32) * m, axis=1)
    sum_mask = jnp.maximum(jnp.sum(m, axis=1), 1e-9)
    return sum_emb / sum_mask


if __name__ == "__main__":
    key = jax.random.PRNGKey(0)
    k1, k2 = jax.random.split(key)

    B, S, H = 2, 8, 32
    last_hidden_state = jax.random.normal(k1, (B, S, H), dtype=jnp.float32)
    # Attention mask: 1s for valid tokens, 0s for padding (int, like PyTorch).
    attention_mask = (jax.random.uniform(k2, (B, S)) > 0.3).astype(jnp.int32)

    out = mean_pooling(last_hidden_state, attention_mask)
    out = jax.block_until_ready(out)

    ref = mean_pooling_ref(last_hidden_state, attention_mask)
    assert out.shape == (B, H)
    assert jnp.allclose(out, ref, atol=1e-5, rtol=1e-5), "mismatch vs reference"

    print("KERNEL_OK")
</pallas_src>

<mosaic_0001>
module attributes {stable_mosaic.version = 11 : i64} {
  func.func @mean_pool_kernel(%arg0: i32, %arg1: i32, %arg2: i32, %arg3: memref<2x8x32xf32, #tpu.memory_space<vmem>>, %arg4: memref<2x8x1xi32, #tpu.memory_space<vmem>>, %arg5: memref<2x1xf32, #tpu.memory_space<vmem>>, %arg6: memref<2x32xf32, #tpu.memory_space<vmem>>) attributes {dimension_semantics = [#tpu.dimension_semantics<parallel>, #tpu.dimension_semantics<parallel>, #tpu.dimension_semantics<arbitrary>], iteration_bounds = array<i64: 1, 1, 1>, scalar_prefetch = 0 : i64, scratch_operands = 0 : i64, tpu.core_type = #tpu.core_type<tc>, window_params = [{transform_indices = @transform_0, window_bounds = array<i64: 2, 8, 32>}, {transform_indices = @transform_1, window_bounds = array<i64: 2, 8, 1>}, {transform_indices = @transform_2, window_bounds = array<i64: 2, 1>}, {transform_indices = @transform_3, window_bounds = array<i64: 2, 32>}]} {
    %c0_i32 = arith.constant 0 : i32
    %0 = arith.cmpi eq, %arg2, %c0_i32 : i32
    %1 = arith.extui %0 : i1 to i32
    %c0_i32_0 = arith.constant 0 : i32
    %2 = arith.cmpi ne, %1, %c0_i32_0 : i32
    scf.if %2 {
      %cst_12 = arith.constant 0.000000e+00 : f32
      %15 = vector.broadcast %cst_12 : f32 to vector<2x32xf32>
      %c0_13 = arith.constant 0 : index
      %c0_14 = arith.constant 0 : index
      %16 = vector.load %arg6[%c0_13, %c0_14] : memref<2x32xf32, #tpu.memory_space<vmem>>, vector<2x32xf32>
      tpu.vector_store %arg6[%c0_13, %c0_14], %15 {strides = array<i32>} : memref<2x32xf32, #tpu.memory_space<vmem>>, vector<2x32xf32>,
    } else {
    }
    %c0 = arith.constant 0 : index
    %c0_1 = arith.constant 0 : index
    %c0_2 = arith.constant 0 : index
    %3 = vector.load %arg3[%c0, %c0_1, %c0_2] : memref<2x8x32xf32, #tpu.memory_space<vmem>>, vector<2x8x32xf32>
    %c0_3 = arith.constant 0 : index
    %c0_4 = arith.constant 0 : index
    %c0_5 = arith.constant 0 : index
    %4 = vector.load %arg4[%c0_3, %c0_4, %c0_5] : memref<2x8x1xi32, #tpu.memory_space<vmem>>, vector<2x8x1xi32>
    %5 = arith.sitofp %4 : vector<2x8x1xi32> to vector<2x8x1xf32>
    %6 = vector.broadcast %5 : vector<2x8x1xf32> to vector<2x8x32xf32>
    %7 = arith.mulf %3, %6 : vector<2x8x32xf32>
    %c0_6 = arith.constant 0 : index
    %c0_7 = arith.constant 0 : index
    %8 = vector.load %arg6[%c0_6, %c0_7] : memref<2x32xf32, #tpu.memory_space<vmem>>, vector<2x32xf32>
    %cst = arith.constant dense<0.000000e+00> : vector<2x32xf32>
    %9 = vector.multi_reduction <add>, %7, %cst [1] : vector<2x8x32xf32> to vector<2x32xf32>
    %10 = arith.addf %8, %9 : vector<2x32xf32>
    %c0_8 = arith.constant 0 : index
    %c0_9 = arith.constant 0 : index
    %11 = vector.load %arg6[%c0_8, %c0_9] : memref<2x32xf32, #tpu.memory_space<vmem>>, vector<2x32xf32>
    tpu.vector_store %arg6[%c0_8, %c0_9], %10 {strides = array<i32>} : memref<2x32xf32, #tpu.memory_space<vmem>>, vector<2x32xf32>,
    %c0_i32_10 = arith.constant 0 : i32
    %12 = arith.cmpi eq, %arg2, %c0_i32_10 : i32
    %13 = arith.extui %12 : i1 to i32
    %c0_i32_11 = arith.constant 0 : i32
    %14 = arith.cmpi ne, %13, %c0_i32_11 : i32
    scf.if %14 {
      %c0_12 = arith.constant 0 : index
      %c0_13 = arith.constant 0 : index
      %15 = vector.load %arg6[%c0_12, %c0_13] : memref<2x32xf32, #tpu.memory_space<vmem>>, vector<2x32xf32>
      %c0_14 = arith.constant 0 : index
      %c0_15 = arith.constant 0 : index
      %16 = vector.load %arg5[%c0_14, %c0_15] : memref<2x1xf32, #tpu.memory_space<vmem>>, vector<2x1xf32>
      %17 = vector.broadcast %16 : vector<2x1xf32> to vector<2x32xf32>
      %18 = arith.divf %15, %17 : vector<2x32xf32>
      %c0_16 = arith.constant 0 : index
      %c0_17 = arith.constant 0 : index
      %19 = vector.load %arg6[%c0_16, %c0_17] : memref<2x32xf32, #tpu.memory_space<vmem>>, vector<2x32xf32>
      tpu.vector_store %arg6[%c0_16, %c0_17], %18 {strides = array<i32>} : memref<2x32xf32, #tpu.memory_space<vmem>>, vector<2x32xf32>,
    } else {
    }
    return
  }
  func.func @transform_0(%arg0: i32, %arg1: i32, %arg2: i32) -> (i32, i32, i32) {
    %c0_i32 = arith.constant 0 : i32
    return %arg0, %arg2, %arg1 : i32, i32, i32
  }
  func.func @transform_1(%arg0: i32, %arg1: i32, %arg2: i32) -> (i32, i32, i32) {
    %c0_i32 = arith.constant 0 : i32
    %c0_i32_0 = arith.constant 0 : i32
    return %arg0, %arg2, %c0_i32 : i32, i32, i32
  }
  func.func @transform_2(%arg0: i32, %arg1: i32, %arg2: i32) -> (i32, i32) {
    %c0_i32 = arith.constant 0 : i32
    %c0_i32_0 = arith.constant 0 : i32
    return %arg0, %c0_i32 : i32, i32
  }
  func.func @transform_3(%arg0: i32, %arg1: i32, %arg2: i32) -> (i32, i32) {
    %c0_i32 = arith.constant 0 : i32
    return %arg0, %arg1 : i32, i32
  }
}

</mosaic_0001>

<bundles_post_ra>
// kernel: tpu_custom_call.1
= control target key start
LH: loop header
LB: loop body
LE: loop exit
PB: predicated region body
PF: predicated region fallthrough
CT: control target
= control target key end

     0   :  { %v138_v2 = vmov 0   ;;  %s182_s0 = inlined_call_operand.vmem [shape: f32[2,8,32], index: 0, kind: input, shape index: {}]   ;;  %s183_s1 = inlined_call_operand.vmem [shape: s32[2,8,1], index: 1, kind: input, shape index: {}]   ;;  %s184_s2 = inlined_call_operand.vmem [shape: f32[2,1], index: 2, kind: input, shape index: {}]   ;;  %s185_s3 = inlined_call_operand.hbm [shape: f32[2,32], index: 3, kind: output, shape index: {}]  }
   0x1   :  { %v23_v0 = vld [vmem:[%s183_s1] sm:$0xff]  ;;  %108 = vset.pattern.permute.xlu0 %v138_v2  ;;  %109 = vset.pattern.permute.xlu1 %v138_v2 }
   0x2   :  { %v67_v1 = vld [vmem:[%s184_s2] sm:$0x3]  ;;  %v25_v3 = vcvt.s32.f32 %v23_v0 }
   0x3   :  { %8 = vsyncpa [#allocation3], 0  ;;  %70 = vperm.xlu1 %109, %v67_v1   ;;  %v24_v4 = vld [vmem:[%s183_s1 + $0x8] sm:$0xff]  ;;  %vm19_vm0 = vcmask 254976   ;;  %v139_v6 = vmov 0.0   ;;  %v21_v7 = vld [vmem:[%s182_s0] sm:$0xff] }
   0x4   :  { %29 = vperm.xlu0 %108, %v25_v3   ;;  %v26_v5 = vcvt.s32.f32 %v24_v4  ;;  %20 = vst.msk [vmem:[#allocation2] sm:$0x3] %vm19_vm0, %v139_v6  ;;  %vm40_vm1 = vcmask 261120   ;;  %v22_v14 = vld [vmem:[%s182_s0 + $0x8] sm:$0xff]  ;;  %vm57_vm2 = vcmask 1041409   ;;  %s140_s0 = smov [#allocation2]  }
   0x5   :  { %s94_s20 = sshll.u32 %s140_s0, 4  ;;  %s96_s23 = sshll.u32 %s185_s3, 4  ;;  %s95_s20 = int_to_ptr.vmem [resolvable:$true] %s94_s20  ;;  %s97_s23 = int_to_ptr.hbm [resolvable:$true] %s96_s23 }
   0xb   :  { %v39_v31 = vld [vmem:[#allocation2] sm:$0x3] }
   0xc   :  { %34 = vperm.xlu0 %108, %v26_v5  }
  0x75   :  { %v71_v11 = vpop.permute.xlu1 %70 }
  0x76   :  { %v30_v8 = vpop.permute.xlu0 %29  ;;  %110 = vrcp.f32 %v71_v11  ;;  %vm78_vm3 = vweird.f32 %v71_v11  ;;  %v84_v35 = vand.u32 2147483648, %v71_v11  ;;  %v82_v37 = vand.u32 2147483647, %v71_v11 }
  0x77   :  { %v37_v9 = vmul.f32 %v30_v8, %v21_v7 }
  0x78   :  { %v85_v38 = vor.u32 1.1754944e-38, %v84_v35  ;;  %vm83_vm6 = vcmp.eq.f32.partialorder %v82_v37, 8.507059e+37 }
  0x79   :  { %v41_v10 = vsel %vm40_vm1, %v37_v9, 0.0 }
  0x7a   :  { %v42_v12 = vrot.slane %v41_v10, 4 }
  0x7c   :  { %v43_v13 = vadd.f32 %v42_v12, %v41_v10  ;;  %v111_v19 = vpop.eup %110 }
  0x7d   :  { %v74_v23 = vmul.f32 %v111_v19, %v71_v11  ;;  %vm79_vm4 = vweird.f32 %v111_v19 }
  0x7e   :  { %v35_v15 = vpop.permute.xlu0 %34  ;;  %v44_v17 = vrot.slane %v43_v13, 2  ;;  %vm80_vm5 = vmor %vm78_vm3, %vm79_vm4 }
  0x7f   :  { %v38_v16 = vmul.f32 %v35_v15, %v22_v14  ;;  %v75_v27 = vsub.f32 1.0, %v74_v23 }
  0x80   :  { %v45_v21 = vadd.f32 %v44_v17, %v43_v13 }
  0x81   :  { %v48_v18 = vsel %vm40_vm1, %v38_v16, 0.0  ;;  %v76_v32 = vmul.f32 %v111_v19, %v75_v27 }
  0x82   :  { %v49_v20 = vrot.slane %v48_v18, 4  ;;  %v46_v25 = vrot.slane %v45_v21, 1 }
  0x83   :  { %v77_v36 = vadd.f32 %v111_v19, %v76_v32 }
  0x84   :  { %v50_v22 = vadd.f32 %v49_v20, %v48_v18  ;;  %v47_v29 = vadd.f32 %v46_v25, %v45_v21 }
  0x85   :  { %v81_v39 = vsel %vm80_vm5, %v111_v19, %v77_v36 }
  0x86   :  { %v51_v24 = vrot.slane %v50_v22, 2  ;;  %v86_v40 = vsel %vm83_vm6, %v85_v38, %v81_v39 }
  0x88   :  { %v52_v26 = vadd.f32 %v51_v24, %v50_v22 }
  0x8a   :  { %v53_v28 = vrot.slane %v52_v26, 1 }
  0x8c   :  { %v54_v30 = vadd.f32 %v53_v28, %v52_v26 }
  0x8e   :  { %v58_v33 = vsel %vm57_vm2, %v54_v30, %v47_v29 }
  0x8f   :  { %v60_v34 = vadd.f32 %v58_v33, %v39_v31 }
  0x91   :  { %62 = vst.msk [vmem:[#allocation2] sm:$0x3] %vm19_vm0, %v60_v34 }
  0x98   :  { %v66_v41 = vld [vmem:[#allocation2] sm:$0x3] }
  0x99   :  { %v87_v42 = vmul.f32 %v86_v40, %v66_v41 }
  0x9b   :  { %88 = vst.msk [vmem:[#allocation2] sm:$0x3] %vm19_vm0, %v87_v42 }
  0x9c   :  { %99 = dma.vmem_to_hbm [thread:$0]  %s95_s20, 32, %s97_s23, [#allocation3]  }
  0x9d   :  { %136 = dma.done.wait [#allocation3], 32  }
  0x9e   :  { %137 = vsyncadd [#allocation3], 4294967264 }
  0x9f   :  { %104 = vsyncpa [#allocation3], 1 }

</bundles_post_ra>
